<compile_context>
chip_gen: v7x
topology: tpu7x:2x2x1
jax: 0.10.0
libtpu: 0.0.40
codegen_flags: <defaults>
</compile_context>

<pallas_src>
import jax
import jax.numpy as jnp
from jax import lax
from jax.experimental import pallas as pl
from jax.experimental.pallas import tpu as pltpu


_VMEM_LIMIT = 48 * 1024 * 1024   # explicit scoped-VMEM limit (safe on v5e/v6e/v7x)


# ---------------------------------------------------------------------------
# Stages 1 & 3: generic parallel matmul + bias kernel   out = a @ w + b
# ---------------------------------------------------------------------------
def _matmul_bias_kernel(a_ref, w_ref, b_ref, o_ref):
    o_ref[...] = (jnp.dot(a_ref[...], w_ref[...],
                          preferred_element_type=jnp.float32)
                  + b_ref[...]).astype(o_ref.dtype)


def _pick_tm(M, cap=256):
    if M <= cap:
        return M
    for t in range(cap, 7, -8):            # cap is 8-aligned -> multiples of 8
        if M % t == 0:
            return t
    return M                               # whole dim is always a legal block


def _pick_tn(N, cap=512):
    if N % 128 != 0:
        return N                           # block == full dim is always legal
    if N <= cap:
        return N
    for t in range(cap, 127, -128):
        if N % t == 0:
            return t
    return N


def matmul_bias(a, w, b):
    """a: [M, K], w: [K, N], b: [1, N] -> [M, N] f32; parallel (M, N) grid."""
    M, K = a.shape
    _, N = w.shape
    tm, tn = _pick_tm(M), _pick_tn(N)
    grid = (M // tm, N // tn)
    return pl.pallas_call(
        _matmul_bias_kernel,
        out_shape=jax.ShapeDtypeStruct((M, N), jnp.float32),
        grid_spec=pltpu.PrefetchScalarGridSpec(
            num_scalar_prefetch=0,
            grid=grid,
            in_specs=[
                pl.BlockSpec((tm, K), lambda i, j: (i, 0)),
                pl.BlockSpec((K, tn), lambda i, j: (0, j)),
                pl.BlockSpec((1, tn), lambda i, j: (0, j)),
            ],
            out_specs=pl.BlockSpec((tm, tn), lambda i, j: (i, j)),
        ),
        compiler_params=pltpu.CompilerParams(
            dimension_semantics=("parallel", "parallel"),
            vmem_limit_bytes=_VMEM_LIMIT),
    )(a, w, b)


# ---------------------------------------------------------------------------
# Stage 2: serial 2-layer LSTM recurrence (PyTorch gate order [i, f, g, o])
# ---------------------------------------------------------------------------
def _apply_gates(gates, c_prev, H):
    i = jax.nn.sigmoid(gates[:, 0:H])
    f = jax.nn.sigmoid(gates[:, H:2 * H])
    g = jnp.tanh(gates[:, 2 * H:3 * H])
    o = jax.nn.sigmoid(gates[:, 3 * H:4 * H])
    c_new = f * c_prev + i * g
    h_new = o * jnp.tanh(c_new)
    return h_new, c_new


def lstm_recurrence_kernel(xproj_ref, h_init_ref, c_init_ref,
                           whh0_ref, w1_ref, b1_ref,
                           hseq_ref, h_out_ref, c_out_ref,
                           state_s):
    chunk = pl.program_id(0)
    TS, _, H = hseq_ref.shape

    # Load initial state into the persistent VMEM scratch on the first chunk.
    @pl.when(chunk == 0)
    def _():
        state_s[0] = h_init_ref[0]
        state_s[1] = c_init_ref[0]
        state_s[2] = h_init_ref[1]
        state_s[3] = c_init_ref[1]

    whh0 = whh0_ref[...]
    w1 = w1_ref[...]
    b1 = b1_ref[...]

    def step(t, carry):
        h0, c0, h1, c1 = state_s[0], state_s[1], state_s[2], state_s[3]
        # Layer 0: x @ W_ih0 + b0 was hoisted out (precomputed as xproj).
        gates0 = xproj_ref[t] + jnp.dot(h0, whh0,
                                        preferred_element_type=jnp.float32)
        h0n, c0n = _apply_gates(gates0, c0, H)
        # Layer 1: single fused matmul over concat([x = h0n, h1]).
        gates1 = jnp.dot(jnp.concatenate([h0n, h1], axis=-1), w1,
                         preferred_element_type=jnp.float32) + b1
        h1n, c1n = _apply_gates(gates1, c1, H)
        state_s[0] = h0n
        state_s[1] = c0n
        state_s[2] = h1n
        state_s[3] = c1n
        hseq_ref[t] = h1n
        return carry

    lax.fori_loop(0, TS, step, 0, unroll=(TS <= 32))

    # Emit final hidden / cell state on the last chunk (constant-index
    # out_spec keeps these blocks resident across the whole grid).
    @pl.when(chunk == pl.num_programs(0) - 1)
    def _():
        h_out_ref[0] = state_s[0]
        h_out_ref[1] = state_s[2]
        c_out_ref[0] = state_s[1]
        c_out_ref[1] = state_s[3]


def _pick_time_chunk(S, B, H, budget_bytes=4 << 20):
    """Largest divisor of S whose (xproj + hseq) chunk fits a small VMEM budget."""
    per_t = B * (5 * H) * 4                 # 4H xproj + H hseq per step, f32
    cap = int(max(1, min(S, budget_bytes // max(per_t, 1))))
    for ts in range(cap, 0, -1):
        if S % ts == 0:
            return ts
    return 1


# ---------------------------------------------------------------------------
# Wrapper matching Method_RNN_Generator.forward (LSTM, 2 layers, batch_first)
# ---------------------------------------------------------------------------
def rnn_generator_forward(x_ids, params, h0=None, c0=None):
    """x_ids: int32 [B, S] -> (logits [B, S, V], (h_n, c_n) each [2, B, H])."""
    emb_table = params["embedding"]                     # [V, E]
    B, S = x_ids.shape
    E = emb_table.shape[1]
    H = params["whh0"].shape[0]
    V = params["wfc"].shape[1]

    # Embedding gather directly into time-major layout (transpose the tiny id
    # matrix instead of the big embedded tensor).
    emb_tm = emb_table[x_ids.T].astype(jnp.float32)     # [S, B, E]

    if h0 is None:
        h0 = jnp.zeros((2, B, H), jnp.float32)
    if c0 is None:
        c0 = jnp.zeros((2, B, H), jnp.float32)

    # ---- Stage 1: hoisted input projection (parallel MXU matmul) -----------
    xproj = matmul_bias(emb_tm.reshape(S * B, E),
                        params["wih0"], params["b0"]).reshape(S, B, 4 * H)

    # ---- Stage 2: serial recurrence over coarse time chunks ----------------
    w1 = jnp.concatenate([params["wih1"], params["whh1"]], axis=0)  # [2H, 4H]
    TS = _pick_time_chunk(S, B, H)
    num_chunks = S // TS

    hseq, h_n, c_n = pl.pallas_call(
        lstm_recurrence_kernel,
        out_shape=(
            jax.ShapeDtypeStruct((S, B, H), jnp.float32),
            jax.ShapeDtypeStruct((2, B, H), jnp.float32),
            jax.ShapeDtypeStruct((2, B, H), jnp.float32),
        ),
        grid_spec=pltpu.PrefetchScalarGridSpec(
            num_scalar_prefetch=0,
            grid=(num_chunks,),
            in_specs=[
                pl.BlockSpec((TS, B, 4 * H), lambda c: (c, 0, 0)),  # x_proj chunk
                pl.BlockSpec((2, B, H), lambda c: (0, 0, 0)),       # h_init
                pl.BlockSpec((2, B, H), lambda c: (0, 0, 0)),       # c_init
                pl.BlockSpec((H, 4 * H), lambda c: (0, 0)),         # W_hh layer0
                pl.BlockSpec((2 * H, 4 * H), lambda c: (0, 0)),     # [W_ih1;W_hh1]
                pl.BlockSpec((1, 4 * H), lambda c: (0, 0)),         # b layer1
            ],
            out_specs=[
                pl.BlockSpec((TS, B, H), lambda c: (c, 0, 0)),      # h1 per step
                pl.BlockSpec((2, B, H), lambda c: (0, 0, 0)),       # h_n
                pl.BlockSpec((2, B, H), lambda c: (0, 0, 0)),       # c_n
            ],
            scratch_shapes=[pltpu.VMEM((4, B, H), jnp.float32)],
        ),
        compiler_params=pltpu.CompilerParams(
            dimension_semantics=("arbitrary",),
            vmem_limit_bytes=_VMEM_LIMIT),
    )(xproj, h0, c0, params["whh0"], w1, params["b1"])

    # ---- Stage 3: hoisted vocab projection (parallel MXU matmul) -----------
    logits_tm = matmul_bias(hseq.reshape(S * B, H),
                            params["wfc"], params["bfc"]).reshape(S, B, V)
    logits = jnp.transpose(logits_tm, (1, 0, 2))        # [B, S, V] (batch_first)
    return logits, (h_n, c_n)


# ---------------------------------------------------------------------------
# Deterministic synthetic parameters (shapes match the nn.Module)
# ---------------------------------------------------------------------------
def make_params(key, vocab_size, embed_dim, hidden_dim):
    ks = jax.random.split(key, 12)
    H, E, V = hidden_dim, embed_dim, vocab_size
    k = 1.0 / jnp.sqrt(jnp.float32(H))
    u = lambda kk, shape: jax.random.uniform(kk, shape, jnp.float32, -k, k)

    emb = jax.random.normal(ks[0], (V, E), jnp.float32)
    emb = emb.at[0].set(0.0)                            # padding_idx=0

    params = {
        "embedding": emb,
        # layer 0: weight_ih_l0 (4H, E), weight_hh_l0 (4H, H) -> pre-transposed
        "wih0": u(ks[1], (4 * H, E)).T,
        "whh0": u(ks[2], (4 * H, H)).T,
        "b0": (u(ks[3], (4 * H,)) + u(ks[4], (4 * H,))).reshape(1, 4 * H),
        # layer 1: weight_ih_l1 (4H, H), weight_hh_l1 (4H, H)
        "wih1": u(ks[5], (4 * H, H)).T,
        "whh1": u(ks[6], (4 * H, H)).T,
        "b1": (u(ks[7], (4 * H,)) + u(ks[8], (4 * H,))).reshape(1, 4 * H),
        # fc: Linear(hidden_dim, vocab_size) weight (V, H) -> transposed
        "wfc": u(ks[9], (V, H)).T,
        "bfc": u(ks[10], (V,)).reshape(1, V),
    }
    return params


def _reference_forward(x_ids, params):
    """Pure-JAX reference (lax.scan) for a sanity check."""
    emb = params["embedding"][x_ids].astype(jnp.float32)       # [B, S, E]
    B, S, E = emb.shape
    H = params["whh0"].shape[0]

    def cell(x, h, c, wih, whh, b):
        g = x @ wih + h @ whh + b
        i, f, gg, o = jnp.split(g, 4, axis=-1)
        c = jax.nn.sigmoid(f) * c + jax.nn.sigmoid(i) * jnp.tanh(gg)
        h = jax.nn.sigmoid(o) * jnp.tanh(c)
        return h, c

    def step(carry, x_t):
        h0, c0, h1, c1 = carry
        h0, c0 = cell(x_t, h0, c0, params["wih0"], params["whh0"], params["b0"])
        h1, c1 = cell(h0, h1, c1, params["wih1"], params["whh1"], params["b1"])
        return (h0, c0, h1, c1), h1

    z = jnp.zeros((B, H), jnp.float32)
    carry, hs = jax.lax.scan(step, (z, z, z, z), jnp.transpose(emb, (1, 0, 2)))
    out = jnp.transpose(hs, (1, 0, 2))                         # [B, S, H]
    logits = out @ params["wfc"] + params["bfc"]
    h_n = jnp.stack([carry[0], carry[2]])
    c_n = jnp.stack([carry[1], carry[3]])
    return logits, (h_n, c_n)


if __name__ == "__main__":
    B, S = 2, 8
    VOCAB, EMBED, HIDDEN = 64, 32, 32

    key = jax.random.PRNGKey(0)
    k_param, k_ids = jax.random.split(key)
    params = make_params(k_param, VOCAB, EMBED, HIDDEN)
    x = jax.random.randint(k_ids, (B, S), 0, VOCAB, dtype=jnp.int32)

    logits, (h_n, c_n) = rnn_generator_forward(x, params)
    jax.block_until_ready((logits, h_n, c_n))

    ref_logits, (ref_h, ref_c) = _reference_forward(x, params)
    assert logits.shape == (B, S, VOCAB)
    assert h_n.shape == (2, B, HIDDEN) and c_n.shape == (2, B, HIDDEN)
    assert jnp.allclose(logits, ref_logits, atol=5e-4), "logits mismatch"
    assert jnp.allclose(h_n, ref_h, atol=5e-4), "h_n mismatch"
    assert jnp.allclose(c_n, ref_c, atol=5e-4), "c_n mismatch"

    print("KERNEL_OK")
</pallas_src>

<mosaic_0001>
module attributes {stable_mosaic.version = 11 : i64} {
  func.func @_matmul_bias_kernel(%arg0: i32, %arg1: i32, %arg2: memref<16x32xf32, #tpu.memory_space<vmem>>, %arg3: memref<32x128xf32, #tpu.memory_space<vmem>>, %arg4: memref<1x128xf32, #tpu.memory_space<vmem>>, %arg5: memref<16x128xf32, #tpu.memory_space<vmem>>) attributes {dimension_semantics = [#tpu.dimension_semantics<parallel>, #tpu.dimension_semantics<parallel>], iteration_bounds = array<i64: 1, 1>, scalar_prefetch = 0 : i64, scratch_operands = 0 : i64, tpu.core_type = #tpu.core_type<tc>, window_params = [{transform_indices = @transform_0, window_bounds = array<i64: 16, 32>}, {transform_indices = @transform_1, window_bounds = array<i64: 32, 128>}, {transform_indices = @transform_2, window_bounds = array<i64: 1, 128>}, {transform_indices = @transform_3, window_bounds = array<i64: 16, 128>}]} {
    %c0 = arith.constant 0 : index
    %c0_0 = arith.constant 0 : index
    %0 = vector.load %arg2[%c0, %c0_0] : memref<16x32xf32, #tpu.memory_space<vmem>>, vector<16x32xf32>
    %c0_1 = arith.constant 0 : index
    %c0_2 = arith.constant 0 : index
    %1 = vector.load %arg3[%c0_1, %c0_2] : memref<32x128xf32, #tpu.memory_space<vmem>>, vector<32x128xf32>
    %cst = arith.constant dense<0.000000e+00> : vector<16x128xf32>
    %2 = tpu.matmul %0, %1, %cst {dimension_numbers = #tpu.dot_dimension_numbers<[1], [0], [0], [1], [0, 0, 1, 1], [], []>} : vector<16x32xf32>, vector<32x128xf32>, vector<16x128xf32> -> vector<16x128xf32>
    %c0_3 = arith.constant 0 : index
    %c0_4 = arith.constant 0 : index
    %3 = vector.load %arg4[%c0_3, %c0_4] : memref<1x128xf32, #tpu.memory_space<vmem>>, vector<1x128xf32>
    %4 = vector.broadcast %3 : vector<1x128xf32> to vector<16x128xf32>
    %5 = arith.addf %2, %4 : vector<16x128xf32>
    %c0_5 = arith.constant 0 : index
    %c0_6 = arith.constant 0 : index
    %6 = vector.load %arg5[%c0_5, %c0_6] : memref<16x128xf32, #tpu.memory_space<vmem>>, vector<16x128xf32>
    tpu.vector_store %arg5[%c0_5, %c0_6], %5 {strides = array<i32>} : memref<16x128xf32, #tpu.memory_space<vmem>>, vector<16x128xf32>,
    return
  }
  func.func @transform_0(%arg0: i32, %arg1: i32) -> (i32, i32) {
    %c0_i32 = arith.constant 0 : i32
    %c0_i32_0 = arith.constant 0 : i32
    return %arg0, %c0_i32 : i32, i32
  }
  func.func @transform_1(%arg0: i32, %arg1: i32) -> (i32, i32) {
    %c0_i32 = arith.constant 0 : i32
    %c0_i32_0 = arith.constant 0 : i32
    return %c0_i32, %arg1 : i32, i32
  }
  func.func @transform_2(%arg0: i32, %arg1: i32) -> (i32, i32) {
    %c0_i32 = arith.constant 0 : i32
    %c0_i32_0 = arith.constant 0 : i32
    return %c0_i32, %arg1 : i32, i32
  }
  func.func @transform_3(%arg0: i32, %arg1: i32) -> (i32, i32) {
    %c0_i32 = arith.constant 0 : i32
    return %arg0, %arg1 : i32, i32
  }
}

</mosaic_0001>

<bundles_post_ra>
// kernel: tpu_custom_call.1
= control target key start
LH: loop header
LB: loop body
LE: loop exit
PB: predicated region body
PF: predicated region fallthrough
CT: control target
= control target key end

     0   :  { %8 = vsyncpa [#allocation3], 0  ;;  %s336_s0 = inlined_call_operand.hbm [shape: f32[16,32], index: 0, kind: input, shape index: {}]   ;;  %s337_s1 = inlined_call_operand.hbm [shape: f32[32,128], index: 1, kind: input, shape index: {}]   ;;  %s338_s2 = inlined_call_operand.vmem [shape: f32[1,128], index: 2, kind: input, shape index: {}]   ;;  %s339_s3 = inlined_call_operand.hbm [shape: f32[16,128], index: 3, kind: output, shape index: {}]  }
   0x1   :  { %9 = vsyncpa [#allocation6], 0 }
   0x2   :  { %10 = vsyncpa [#allocation4], 0  ;;  %s263_s12 = smov [#allocation2]   ;;  %s191_s16 = scalar_lea.hbm %s336_s0, 256 }
   0x3   :  { %s16_s13 = sshll.u32 %s263_s12, 4  ;;  %p192_p0 = scmp.ne.s32.totalorder %s336_s0, %s191_s16  ;;  %s17_s13 = int_to_ptr.vmem [resolvable:$true] %s16_s13 }
   0x4   :  { %p195_p1 = scmp.lt.u32.totalorder %s191_s16, %s336_s0 }
   0x6   :  { %p197_p2 = pnand %p195_p1, %p192_p0 }
   0x8   :  { %200 = shalt.err (!%p197_p2)
}
   0x9   :  { %s201_s21 = scalar_lea.vmem %s17_s13, 256  ;;  %p206_p4 = scmp.lt.s32.totalorder %s17_s13, %s17_s13 }
   0xa   :  { %p202_p3 = scmp.ne.s32.totalorder %s17_s13, %s201_s21  ;;  %p207_p5 = scmp.lt.s32.totalorder %s201_s21, %s201_s21 }
   0xc   :  { %p208_p6 = por %p207_p5, %p206_p4 }
   0xe   :  { %p209_p7 = pnand %p208_p6, %p202_p3 }
  0x10   :  { %212 = shalt.err (!%p209_p7)
}
  0x11   :  { %s264_s22 = smov 128   ;;  %s265_s23 = smov 8  }
  0x12   :  { %22 = dma.hbm_to_vmem [thread:$0]  %s336_s0, 256, %s17_s13, [#allocation3], %s264_s22, %s264_s22, %s265_s23  }
  0x13   :  { %s266_s26 = smov [#allocation5]   ;;  %s213_s30 = scalar_lea.hbm %s337_s1, 512 }
  0x14   :  { %s28_s27 = sshll.u32 %s266_s26, 4  ;;  %p214_p8 = scmp.ne.s32.totalorder %s337_s1, %s213_s30  ;;  %s29_s27 = int_to_ptr.vmem [resolvable:$true] %s28_s27 }
  0x15   :  { %p217_p9 = scmp.lt.u32.totalorder %s213_s30, %s337_s1 }
  0x17   :  { %p219_p10 = pnand %p217_p9, %p214_p8 }
  0x19   :  { %222 = shalt.err (!%p219_p10)
}
  0x1a   :  { %s223_s8 = scalar_lea.vmem %s29_s27, 512  ;;  %p228_p12 = scmp.lt.s32.totalorder %s29_s27, %s29_s27 }
  0x1b   :  { %p224_p11 = scmp.ne.s32.totalorder %s29_s27, %s223_s8  ;;  %p229_p13 = scmp.lt.s32.totalorder %s223_s8, %s223_s8 }
  0x1d   :  { %p230_p0 = por %p229_p13, %p228_p12 }
  0x1f   :  { %p231_p1 = pnand %p230_p0, %p224_p11 }
  0x21   :  { %234 = shalt.err (!%p231_p1)
}
  0x22   :  { %34 = dma.hbm_to_vmem [thread:$0]  %s337_s1, 512, %s29_s27, [#allocation6], %s264_s22, %s264_s22, %s265_s23  }
  0x23   :  { %257 = dma.done.wait [#allocation3], 256  }
  0x24   :  { %258 = vsyncadd [#allocation3], 4294967040 }
  0x25   :  { %259 = dma.done.wait [#allocation6], 512  }
  0x26   :  { %260 = vsyncadd [#allocation6], 4294966784  ;;  %vm56_vm0 = vcmask 261120   ;;  %v45_v0 = vld [vmem:[#allocation5] sm:$0xff]  ;;  %v46_v1 = vld [vmem:[#allocation5 + $0x8] sm:$0xff]  ;;  %s267_s11 = smov [#allocation7]  }
  0x27   :  { %v47_v2 = vld [vmem:[#allocation5 + $0x10] sm:$0xff]  ;;  %v178_v3 = vpack.c.bf16 %v46_v1, %v45_v0  ;;  %v48_v4 = vld [vmem:[#allocation5 + $0x18] sm:$0xff]  ;;  %s145_s12 = sshll.u32 %s267_s11, 4  ;;  %s146_s12 = int_to_ptr.vmem [resolvable:$true] %s145_s12 }
  0x28   :  { %v43_v5 = vld [vmem:[#allocation2] sm:$0xff]  ;;  %v182_v6 = vpack.c.bf16 %v48_v4, %v47_v2  ;;  %v44_v7 = vld [vmem:[#allocation2 + $0x8] sm:$0xff]  ;;  %s235_s13 = scalar_lea.vmem %s146_s12, 256  ;;  %p240_p3 = scmp.lt.s32.totalorder %s146_s12, %s146_s12 }
  0x29   :  { %175 = vmatprep.mubr.msk.f32.mxu0 %vm56_vm0, %v43_v5  ;;  %179 = vmatprep.subr.bf16.mxu0 %v178_v3  ;;  %v158_v8 = vld [vmem:[%s338_s2] ss:$0 sm:$0xff]  ;;  %p236_p2 = scmp.ne.s32.totalorder %s146_s12, %s235_s13  ;;  %p241_p4 = scmp.lt.s32.totalorder %s235_s13, %s235_s13 }
  0x2a   :  { %181 = vmatpush3.bf16.msra.mxu0 %v178_v3 }
  0x2b   :  { %183 = vmatprep.subr.bf16.mxu0 %v182_v6  ;;  %p242_p5 = por %p241_p4, %p240_p3 }
  0x2d   :  { %p243_p6 = pnand %p242_p5, %p236_p2 }
  0x2e   :  { %185 = vmatpush3.bf16.msra.mxu0 %v182_v6 }
  0x31   :  { %176 = vmatmul.mubr.msk.f32.vlgmr.msra.gmra.mrb[0].mxu0 %vm56_vm0, %v44_v7 }
 0x104   :  { %v177_v9 = vpop.f32.mrb[0].mxu0 }
 0x105   :  { %v135_v10 = vadd.f32 %v177_v9, %v158_v8  ;;  %v129_v11 = vpop.f32.mrb[1].mxu0 }
 0x106   :  { %v130_v12 = vadd.f32 %v158_v8, %v129_v11 }
 0x107   :  { %139 = vst [vmem:[#allocation7 + $0x8] sm:$0xff] %v135_v10 }
 0x108   :  { %138 = vst [vmem:[#allocation7] sm:$0xff] %v130_v12 }
 0x109   :  { %246 = shalt.err (!%p243_p6)
}
 0x10a   :  { %s247_s2 = scalar_lea.hbm %s339_s3, 256 }
 0x10b   :  { %p248_p7 = scmp.ne.s32.totalorder %s339_s3, %s247_s2  ;;  %p251_p8 = scmp.lt.u32.totalorder %s247_s2, %s339_s3 }
 0x10d   :  { %p253_p9 = pnand %p251_p8, %p248_p7 }
 0x10f   :  { %256 = shalt.err (!%p253_p9)
}
 0x110   :  { %151 = dma.vmem_to_hbm [thread:$0]  %s146_s12, 256, %s339_s3, [#allocation4], %s264_s22, %s264_s22, %s265_s23  }
 0x111   :  { %261 = dma.done.wait [#allocation4], 256  }
 0x112   :  { %262 = vsyncadd [#allocation4], 4294967040 }
 0x113   :  { %155 = vsyncpa [#allocation3], 1 }
 0x114   :  { %156 = vsyncpa [#allocation6], 1 }
 0x115   :  { %157 = vsyncpa [#allocation4], 1 }

</bundles_post_ra>
